<compile_context>
chip_gen: v7x
topology: tpu7x:2x2x1
jax: 0.10.0
libtpu: 0.0.40
codegen_flags: <defaults>
</compile_context>

<pallas_src>
import math

import jax
import jax.numpy as jnp
from jax.experimental import pallas as pl
from jax.experimental.pallas import tpu as pltpu


def _round_up(x, m):
    return ((x + m - 1) // m) * m


def value_net_kernel(x_ref, w1_ref, b1_ref, w2_ref, b2_ref, w3_ref, b3_ref, o_ref):
    # One batch tile per grid step; weights/biases are VMEM-resident across the
    # whole grid (their index_maps always return block (0, 0)).
    x = x_ref[...]                                               # [TB, n_state] f32

    # fc1 + ReLU: bf16 operands into the MXU, f32 accumulation, f32 elementwise.
    h1 = jnp.dot(x.astype(jnp.bfloat16), w1_ref[...],
                 preferred_element_type=jnp.float32)             # [TB, 256]
    h1 = jnp.maximum(h1 + b1_ref[...], 0.0)

    # fc2 + ReLU
    h2 = jnp.dot(h1.astype(jnp.bfloat16), w2_ref[...],
                 preferred_element_type=jnp.float32)             # [TB, 256]
    h2 = jnp.maximum(h2 + b2_ref[...], 0.0)

    # fc3 (N=1): VPU multiply + XLU lane reduction instead of a 1-column MXU
    # matmul (keeps the MXU slot free, uses otherwise-idle VPU/XLU slots).
    w3 = w3_ref[...].astype(jnp.float32)                         # [1, 256]
    v = jnp.sum(h2 * w3, axis=-1, keepdims=True)                 # [TB, 1]
    # Output is the module's natural [B, 1] shape; the 1-lane store is tiny
    # (<= 2 KiB/tile) next to the weight/activation traffic, so no lane-padding.
    o_ref[...] = v + b3_ref[...]


def _choose_tile_b(B):
    rb = _round_up(max(B, 1), 8)
    if rb <= 512:
        # Small batch: a single tile covers it (grid = 1, no wasted padding).
        return rb
    # Large batch: 512-row tiles -> grid >= 2, so the "parallel" batch axis
    # shards across TensorCores while each tile's activations stay ~0.5 MiB.
    return 512


def value_network_forward(state, params, *, tile_b=None):
    """Runs the full ValueNetwork forward pass as a batch-tiled Pallas kernel."""
    w1, b1, w2, b2, w3, b3 = params
    B, n_state = state.shape
    hidden = w1.shape[1]

    if tile_b is None:
        tile_b = _choose_tile_b(B)

    padded_B = _round_up(B, tile_b)
    if padded_B != B:
        # Pad with zeros; padded rows compute harmless garbage sliced off below.
        state = jnp.pad(state, ((0, padded_B - B), (0, 0)))

    grid = (padded_B // tile_b,)

    # Feature axes are kept as full array dims (no tiling of n_state / hidden),
    # so the (8, 128) block-shape rule is satisfied even for odd n_state.
    resident = lambda i: (0, 0)
    in_specs = [
        pl.BlockSpec((tile_b, n_state), lambda i: (i, 0)),   # state tile
        pl.BlockSpec((n_state, hidden), resident),           # w1 (bf16)
        pl.BlockSpec((1, hidden), resident),                 # b1 (f32)
        pl.BlockSpec((hidden, hidden), resident),            # w2 (bf16)
        pl.BlockSpec((1, hidden), resident),                 # b2 (f32)
        pl.BlockSpec((1, hidden), resident),                 # w3 row (bf16)
        pl.BlockSpec((1, 1), resident),                      # b3 (f32)
    ]
    out_spec = pl.BlockSpec((tile_b, 1), lambda i: (i, 0))

    flops = 2 * padded_B * (n_state * hidden + hidden * hidden + hidden)
    bytes_accessed = (
        w1.size * 2 + w2.size * 2 + w3.size * 2                # bf16 weights
        + (b1.size + b2.size + b3.size) * 4                    # f32 biases
        + padded_B * (n_state + 1) * 4                         # input + output
    )

    out = pl.pallas_call(
        value_net_kernel,
        out_shape=jax.ShapeDtypeStruct((padded_B, 1), jnp.float32),
        grid=grid,
        in_specs=in_specs,
        out_specs=out_spec,
        compiler_params=pltpu.CompilerParams(
            dimension_semantics=("parallel",),
        ),
        cost_estimate=pl.CostEstimate(
            flops=flops, transcendentals=0, bytes_accessed=bytes_accessed),
    )(state, w1, b1, w2, b2, w3, b3)

    return out[:B]


def init_value_network_params(key, n_state, hidden=256):
    """Deterministic init matching PyTorch nn.Linear defaults:
    U(-1/sqrt(fan_in), 1/sqrt(fan_in)) for both weight and bias.
    Weights are stored bf16 ([in, out]); biases stay f32."""
    keys = jax.random.split(key, 6)

    def linear(kw, kb, fan_in, fan_out):
        bound = 1.0 / math.sqrt(fan_in)
        w = jax.random.uniform(kw, (fan_in, fan_out), jnp.float32, -bound, bound)
        b = jax.random.uniform(kb, (1, fan_out), jnp.float32, -bound, bound)
        return w.astype(jnp.bfloat16), b

    w1, b1 = linear(keys[0], keys[1], n_state, hidden)
    w2, b2 = linear(keys[2], keys[3], hidden, hidden)
    w3_col, b3 = linear(keys[4], keys[5], hidden, 1)
    w3 = w3_col.T                      # store fc3 weight as a [1, hidden] row
    return (w1, b1, w2, b2, w3, b3)


if __name__ == "__main__":
    key = jax.random.PRNGKey(0)
    k_params, k_state = jax.random.split(key)

    batch = 2
    n_state = 8  # small state dimension, e.g. a low-dim control env

    params = init_value_network_params(k_params, n_state)
    state = jax.random.normal(k_state, (batch, n_state), dtype=jnp.float32)

    value = value_network_forward(state, params)
    jax.block_until_ready(value)

    # Cross-check against a plain-JAX f32 reference of the same math
    # (bf16 weights upcast; loose tolerance accounts for bf16 rounding).
    w1, b1, w2, b2, w3, b3 = params
    w1f, w2f, w3f = (w.astype(jnp.float32) for w in (w1, w2, w3))
    h1 = jnp.maximum(state @ w1f + b1, 0.0)
    h2 = jnp.maximum(h1 @ w2f + b2, 0.0)
    ref = h2 @ w3f.T + b3
    assert value.shape == (batch, 1)
    assert jnp.allclose(value, ref, atol=2e-2, rtol=2e-2), (value, ref)

    print("KERNEL_OK")
</pallas_src>

<mosaic_0001>
module attributes {stable_mosaic.version = 11 : i64} {
  func.func @value_net_kernel(%arg0: i32, %arg1: memref<8x8xf32, #tpu.memory_space<vmem>>, %arg2: memref<8x256xbf16, #tpu.memory_space<vmem>>, %arg3: memref<1x256xf32, #tpu.memory_space<vmem>>, %arg4: memref<256x256xbf16, #tpu.memory_space<vmem>>, %arg5: memref<1x256xf32, #tpu.memory_space<vmem>>, %arg6: memref<1x256xbf16, #tpu.memory_space<vmem>>, %arg7: memref<1x1xf32, #tpu.memory_space<vmem>>, %arg8: memref<8x1xf32, #tpu.memory_space<vmem>>) attributes {dimension_semantics = [#tpu.dimension_semantics<parallel>], iteration_bounds = array<i64: 1>, scalar_prefetch = 0 : i64, scratch_operands = 0 : i64, tpu.core_type = #tpu.core_type<tc>, window_params = [{transform_indices = @transform_0, window_bounds = array<i64: 8, 8>}, {pipeline_mode = #tpu.pipeline_mode<synchronous>, transform_indices = @transform_1, window_bounds = array<i64: 8, 256>}, {pipeline_mode = #tpu.pipeline_mode<synchronous>, transform_indices = @transform_2, window_bounds = array<i64: 1, 256>}, {pipeline_mode = #tpu.pipeline_mode<synchronous>, transform_indices = @transform_3, window_bounds = array<i64: 256, 256>}, {pipeline_mode = #tpu.pipeline_mode<synchronous>, transform_indices = @transform_4, window_bounds = array<i64: 1, 256>}, {pipeline_mode = #tpu.pipeline_mode<synchronous>, transform_indices = @transform_5, window_bounds = array<i64: 1, 256>}, {pipeline_mode = #tpu.pipeline_mode<synchronous>, transform_indices = @transform_6, window_bounds = array<i64: 1, 1>}, {transform_indices = @transform_7, window_bounds = array<i64: 8, 1>}]} {
    %c0 = arith.constant 0 : index
    %c0_0 = arith.constant 0 : index
    %0 = vector.load %arg1[%c0, %c0_0] : memref<8x8xf32, #tpu.memory_space<vmem>>, vector<8x8xf32>
    %1 = arith.truncf %0 : vector<8x8xf32> to vector<8x8xbf16>
    %c0_1 = arith.constant 0 : index
    %c0_2 = arith.constant 0 : index
    %2 = vector.load %arg2[%c0_1, %c0_2] : memref<8x256xbf16, #tpu.memory_space<vmem>>, vector<8x256xbf16>
    %cst = arith.constant dense<0.000000e+00> : vector<8x256xf32>
    %3 = tpu.matmul %1, %2, %cst {dimension_numbers = #tpu.dot_dimension_numbers<[1], [0], [0], [1], [0, 0, 1, 1], [], []>} : vector<8x8xbf16>, vector<8x256xbf16>, vector<8x256xf32> -> vector<8x256xf32>
    %c0_3 = arith.constant 0 : index
    %c0_4 = arith.constant 0 : index
    %4 = vector.load %arg3[%c0_3, %c0_4] : memref<1x256xf32, #tpu.memory_space<vmem>>, vector<1x256xf32>
    %5 = vector.broadcast %4 : vector<1x256xf32> to vector<8x256xf32>
    %6 = arith.addf %3, %5 : vector<8x256xf32>
    %cst_5 = arith.constant 0.000000e+00 : f32
    %7 = vector.broadcast %cst_5 : f32 to vector<8x256xf32>
    %8 = arith.maximumf %6, %7 : vector<8x256xf32>
    %9 = arith.truncf %8 : vector<8x256xf32> to vector<8x256xbf16>
    %c0_6 = arith.constant 0 : index
    %c0_7 = arith.constant 0 : index
    %10 = vector.load %arg4[%c0_6, %c0_7] : memref<256x256xbf16, #tpu.memory_space<vmem>>, vector<256x256xbf16>
    %cst_8 = arith.constant dense<0.000000e+00> : vector<8x256xf32>
    %11 = tpu.matmul %9, %10, %cst_8 {dimension_numbers = #tpu.dot_dimension_numbers<[1], [0], [0], [1], [0, 0, 1, 1], [], []>} : vector<8x256xbf16>, vector<256x256xbf16>, vector<8x256xf32> -> vector<8x256xf32>
    %c0_9 = arith.constant 0 : index
    %c0_10 = arith.constant 0 : index
    %12 = vector.load %arg5[%c0_9, %c0_10] : memref<1x256xf32, #tpu.memory_space<vmem>>, vector<1x256xf32>
    %13 = vector.broadcast %12 : vector<1x256xf32> to vector<8x256xf32>
    %14 = arith.addf %11, %13 : vector<8x256xf32>
    %cst_11 = arith.constant 0.000000e+00 : f32
    %15 = vector.broadcast %cst_11 : f32 to vector<8x256xf32>
    %16 = arith.maximumf %14, %15 : vector<8x256xf32>
    %c0_12 = arith.constant 0 : index
    %c0_13 = arith.constant 0 : index
    %17 = vector.load %arg6[%c0_12, %c0_13] : memref<1x256xbf16, #tpu.memory_space<vmem>>, vector<1x256xbf16>
    %18 = arith.extf %17 : vector<1x256xbf16> to vector<1x256xf32>
    %19 = vector.broadcast %18 : vector<1x256xf32> to vector<8x256xf32>
    %20 = arith.mulf %16, %19 : vector<8x256xf32>
    %cst_14 = arith.constant dense<0.000000e+00> : vector<8xf32>
    %21 = vector.multi_reduction <add>, %20, %cst_14 [1] : vector<8x256xf32> to vector<8xf32>
    %22 = vector.shape_cast %21 : vector<8xf32> to vector<8x1xf32>
    %c0_15 = arith.constant 0 : index
    %c0_16 = arith.constant 0 : index
    %23 = vector.load %arg7[%c0_15, %c0_16] : memref<1x1xf32, #tpu.memory_space<vmem>>, vector<1x1xf32>
    %24 = vector.broadcast %23 : vector<1x1xf32> to vector<8x1xf32>
    %25 = arith.addf %22, %24 : vector<8x1xf32>
    %c0_17 = arith.constant 0 : index
    %c0_18 = arith.constant 0 : index
    %26 = vector.load %arg8[%c0_17, %c0_18] : memref<8x1xf32, #tpu.memory_space<vmem>>, vector<8x1xf32>
    tpu.vector_store %arg8[%c0_17, %c0_18], %25 {strides = array<i32>} : memref<8x1xf32, #tpu.memory_space<vmem>>, vector<8x1xf32>,
    return
  }
  func.func @transform_0(%arg0: i32) -> (i32, i32) {
    %c0_i32 = arith.constant 0 : i32
    %c0_i32_0 = arith.constant 0 : i32
    return %arg0, %c0_i32 : i32, i32
  }
  func.func @transform_1(%arg0: i32) -> (i32, i32) {
    %c0_i32 = arith.constant 0 : i32
    %c0_i32_0 = arith.constant 0 : i32
    %c0_i32_1 = arith.constant 0 : i32
    return %c0_i32, %c0_i32_0 : i32, i32
  }
  func.func @transform_2(%arg0: i32) -> (i32, i32) {
    %c0_i32 = arith.constant 0 : i32
    %c0_i32_0 = arith.constant 0 : i32
    %c0_i32_1 = arith.constant 0 : i32
    return %c0_i32, %c0_i32_0 : i32, i32
  }
  func.func @transform_3(%arg0: i32) -> (i32, i32) {
    %c0_i32 = arith.constant 0 : i32
    %c0_i32_0 = arith.constant 0 : i32
    %c0_i32_1 = arith.constant 0 : i32
    return %c0_i32, %c0_i32_0 : i32, i32
  }
  func.func @transform_4(%arg0: i32) -> (i32, i32) {
    %c0_i32 = arith.constant 0 : i32
    %c0_i32_0 = arith.constant 0 : i32
    %c0_i32_1 = arith.constant 0 : i32
    return %c0_i32, %c0_i32_0 : i32, i32
  }
  func.func @transform_5(%arg0: i32) -> (i32, i32) {
    %c0_i32 = arith.constant 0 : i32
    %c0_i32_0 = arith.constant 0 : i32
    %c0_i32_1 = arith.constant 0 : i32
    return %c0_i32, %c0_i32_0 : i32, i32
  }
  func.func @transform_6(%arg0: i32) -> (i32, i32) {
    %c0_i32 = arith.constant 0 : i32
    %c0_i32_0 = arith.constant 0 : i32
    %c0_i32_1 = arith.constant 0 : i32
    return %c0_i32, %c0_i32_0 : i32, i32
  }
  func.func @transform_7(%arg0: i32) -> (i32, i32) {
    %c0_i32 = arith.constant 0 : i32
    %c0_i32_0 = arith.constant 0 : i32
    return %arg0, %c0_i32 : i32, i32
  }
}

</mosaic_0001>

<bundles_post_ra>
// kernel: tpu_custom_call.1
= control target key start
LH: loop header
LB: loop body
LE: loop exit
PB: predicated region body
PF: predicated region fallthrough
CT: control target
= control target key end

     0   :  { %s691_s0 = inlined_call_operand.hbm [shape: f32[8,8], index: 0, kind: input, shape index: {}]   ;;  %s692_s1 = inlined_call_operand.hbm [shape: bf16[8,256], index: 1, kind: input, shape index: {}]   ;;  %s693_s2 = inlined_call_operand.vmem [shape: f32[1,256], index: 2, kind: input, shape index: {}]   ;;  %s694_s3 = inlined_call_operand.hbm [shape: bf16[256,256], index: 3, kind: input, shape index: {}]   ;;  %s695_s4 = inlined_call_operand.vmem [shape: f32[1,256], index: 4, kind: input, shape index: {}]   ;;  %s696_s5 = inlined_call_operand.vmem [shape: bf16[1,256], index: 5, kind: input, shape index: {}]   ;;  %s697_s6 = inlined_call_operand.<no memory space> [shape: f32[1,1], index: 6, kind: input, shape index: {}]   ;;  %s698_s7 = inlined_call_operand.vmem [shape: f32[8,1], index: 7, kind: output, shape index: {}]  }
   0x1   :  { %v12_v0 = vstv %s697_s6 }
   0x2   :  { %13 = vst [vmem:[#allocation2] sm:$0x1] %v12_v0 }
   0x3   :  { %14 = vsyncpa [#allocation4], 0 }
   0x4   :  { %15 = vsyncpa [#allocation6], 0  ;;  %s594_s26 = smov [#allocation5]   ;;  %s595_s28 = smov [#allocation3]  }
   0x5   :  { %s32_s27 = sshll.u32 %s594_s26, 4  ;;  %s22_s29 = sshll.u32 %s595_s28, 4  ;;  %s33_s27 = int_to_ptr.vmem [resolvable:$true] %s32_s27  ;;  %s23_s29 = int_to_ptr.vmem [resolvable:$true] %s22_s29 }
   0x6   :  { %s524_s9 = scalar_lea.hbm %s692_s1, 128 }
   0x7   :  { %p525_p0 = scmp.ne.s32.totalorder %s692_s1, %s524_s9  ;;  %p528_p1 = scmp.lt.u32.totalorder %s524_s9, %s692_s1 }
   0x9   :  { %p530_p2 = pnand %p528_p1, %p525_p0 }
   0xb   :  { %533 = shalt.err (!%p530_p2)
}
   0xc   :  { %s534_s6 = scalar_lea.vmem %s33_s27, 128  ;;  %p539_p4 = scmp.lt.s32.totalorder %s33_s27, %s33_s27 }
   0xd   :  { %p535_p3 = scmp.ne.s32.totalorder %s33_s27, %s534_s6  ;;  %p540_p5 = scmp.lt.s32.totalorder %s534_s6, %s534_s6 }
   0xf   :  { %p541_p6 = por %p540_p5, %p539_p4 }
  0x11   :  { %p542_p7 = pnand %p541_p6, %p535_p3 }
  0x13   :  { %545 = shalt.err (!%p542_p7)
}
  0x14   :  { %35 = dma.hbm_to_vmem [thread:$0]  %s692_s1, 128, %s33_s27, [#allocation6]  }
  0x15   :  { %s546_s18 = scalar_lea.hbm %s691_s0, 128 }
  0x16   :  { %p547_p8 = scmp.ne.s32.totalorder %s691_s0, %s546_s18  ;;  %p550_p9 = scmp.lt.u32.totalorder %s546_s18, %s691_s0 }
  0x18   :  { %p552_p10 = pnand %p550_p9, %p547_p8 }
  0x1a   :  { %555 = shalt.err (!%p552_p10)
}
  0x1b   :  { %s556_s23 = scalar_lea.vmem %s23_s29, 128  ;;  %p561_p12 = scmp.lt.s32.totalorder %s23_s29, %s23_s29 }
  0x1c   :  { %p557_p11 = scmp.ne.s32.totalorder %s23_s29, %s556_s23  ;;  %p562_p13 = scmp.lt.s32.totalorder %s556_s23, %s556_s23 }
  0x1e   :  { %p563_p0 = por %p562_p13, %p561_p12 }
  0x20   :  { %p564_p1 = pnand %p563_p0, %p557_p11 }
  0x22   :  { %567 = shalt.err (!%p564_p1)
}
  0x23   :  { %25 = dma.hbm_to_vmem [thread:$0]  %s691_s0, 128, %s23_s29, [#allocation4]  }
  0x24   :  { %s596_s25 = smov [#allocation7]   ;;  %s568_s30 = scalar_lea.hbm %s694_s3, 4096 }
  0x25   :  { %s43_s26 = sshll.u32 %s596_s25, 4  ;;  %p569_p2 = scmp.ne.s32.totalorder %s694_s3, %s568_s30  ;;  %s44_s26 = int_to_ptr.vmem [resolvable:$true] %s43_s26 }
  0x26   :  { %p572_p3 = scmp.lt.u32.totalorder %s568_s30, %s694_s3 }
  0x28   :  { %p574_p4 = pnand %p572_p3, %p569_p2 }
  0x2a   :  { %577 = shalt.err (!%p574_p4)
}
  0x2b   :  { %s578_s12 = scalar_lea.vmem %s44_s26, 4096  ;;  %p583_p6 = scmp.lt.s32.totalorder %s44_s26, %s44_s26 }
  0x2c   :  { %p579_p5 = scmp.ne.s32.totalorder %s44_s26, %s578_s12  ;;  %p584_p7 = scmp.lt.s32.totalorder %s578_s12, %s578_s12 }
  0x2e   :  { %p585_p8 = por %p584_p7, %p583_p6 }
  0x30   :  { %p586_p9 = pnand %p585_p8, %p579_p5 }
  0x32   :  { %589 = shalt.err (!%p586_p9)
}
  0x33   :  { %s597_s0 = smov 128   ;;  %s598_s29 = smov 8  }
  0x34   :  { %49 = dma.hbm_to_vmem [thread:$0]  %s694_s3, 4096, %s44_s26, [#allocation6], %s597_s0, %s597_s0, %s598_s29  }
  0x35   :  { %590 = dma.done.wait [#allocation4], 128  }
  0x36   :  { %591 = vsyncadd [#allocation4], 4294967168 }
  0x37   :  { %592 = dma.done.wait [#allocation6], 4224  }
  0x38   :  { %593 = vsyncadd [#allocation6], 4294963072  ;;  %v599_v1 = vmov 0   ;;  %v68_v2 = vld [vmem:[#allocation5] sm:$0xff]  ;;  %vm90_vm0 = vcmask 1043456   ;;  %v66_v3 = vld [vmem:[#allocation3] sm:$0xff]  ;;  %v71_v40 = vlaneseq }
  0x39   :  { %129 = vmatprep.mubr.bf16.mxu0 %v599_v1  ;;  %v432_v4 = vcombine.high %v68_v2, %v68_v2  ;;  %v431_v5 = vcombine.low %v68_v2, %v68_v2  ;;  %v476_v6 = vld [vmem:[#allocation7 + $0x4] ss:$8 sps:$4 sm:$0xff]   ;;  %v478_v7 = vld [vmem:[#allocation7] ss:$8 sps:$4 sm:$0xff]   ;;  %v479_v8 = vld [vmem:[#allocation7 + $0x14] ss:$8 sps:$4 sm:$0xff]   ;;  %v67_v10 = vpack.c.bf16 %v66_v3, %v66_v3 }
  0x3a   :  { %346 = vmatprep.subr.bf16.mxu1 %v476_v6  ;;  %vm86_vm1 = vcmask 64512   ;;  %v481_v11 = vld [vmem:[#allocation7 + $0x10] ss:$8 sps:$4 sm:$0xff]   ;;  %v482_v12 = vld [vmem:[#allocation7 + $0x24] ss:$8 sps:$4 sm:$0xff]   ;;  %v72_v41 = vshrl.u32 %v71_v40, 7 }
  0x3b   :  { %433 = vmatprep.subr.msk.bf16.mxu0 %vm90_vm0, %v432_v4  ;;  %v92_v9 = vsel %vm90_vm0, %v431_v5, 0  ;;  %347 = vmatpush1.bf16.msra.mxu1 %v478_v7  ;;  %v484_v13 = vld [vmem:[#allocation7 + $0x20] ss:$8 sps:$4 sm:$0xff]   ;;  %v485_v14 = vld [vmem:[#allocation7 + $0x34] ss:$8 sps:$4 sm:$0xff]   ;;  %vm423_vm2 = vcmask 7168  }
  0x3c   :  { %98 = vmatpush1.bf16.msra.mxu0 %v92_v9  ;;  %348 = vmatprep.subr.bf16.mxu1 %v479_v8  ;;  %v487_v15 = vld [vmem:[#allocation7 + $0x30] ss:$8 sps:$4 sm:$0xff]   ;;  %v488_v16 = vld [vmem:[#allocation7 + $0x44] ss:$8 sps:$4 sm:$0xff]   ;;  %v490_v17 = vld [vmem:[#allocation7 + $0x40] ss:$8 sps:$4 sm:$0xff]  }
  0x3d   :  { %v491_v18 = vld [vmem:[#allocation7 + $0x54] ss:$8 sps:$4 sm:$0xff]   ;;  %v493_v19 = vld [vmem:[#allocation7 + $0x50] ss:$8 sps:$4 sm:$0xff]   ;;  %v494_v20 = vld [vmem:[#allocation7 + $0x64] ss:$8 sps:$4 sm:$0xff]  }
  0x3e   :  { %v496_v21 = vld [vmem:[#allocation7 + $0x60] ss:$8 sps:$4 sm:$0xff]   ;;  %v497_v22 = vld [vmem:[#allocation7 + $0x74] ss:$8 sps:$4 sm:$0xff]   ;;  %v499_v23 = vld [vmem:[#allocation7 + $0x70] ss:$8 sps:$4 sm:$0xff]  }
  0x3f   :  { %434 = vmatmul.mubr.msk.bf16.vlgmr.msra.gmra.mrb[0].mxu0 %vm86_vm1, %v67_v10  ;;  %349 = vmatpush1.bf16.msra.mxu1 %v481_v11  ;;  %v500_v24 = vld [vmem:[#allocation7 + $0x84] ss:$8 sps:$4 sm:$0xff]   ;;  %v502_v25 = vld [vmem:[#allocation7 + $0x80] ss:$8 sps:$4 sm:$0xff]   ;;  %v503_v26 = vld [vmem:[#allocation7 + $0x94] ss:$8 sps:$4 sm:$0xff]  }
  0x40   :  { %350 = vmatprep.subr.bf16.mxu1 %v482_v12  ;;  %v505_v27 = vld [vmem:[#allocation7 + $0x90] ss:$8 sps:$4 sm:$0xff]   ;;  %v506_v28 = vld [vmem:[#allocation7 + $0xa4] ss:$8 sps:$4 sm:$0xff]   ;;  %v508_v29 = vld [vmem:[#allocation7 + $0xa0] ss:$8 sps:$4 sm:$0xff]  }
  0x41   :  { %v509_v30 = vld [vmem:[#allocation7 + $0xb4] ss:$8 sps:$4 sm:$0xff]   ;;  %v511_v31 = vld [vmem:[#allocation7 + $0xb0] ss:$8 sps:$4 sm:$0xff]   ;;  %v512_v32 = vld [vmem:[#allocation7 + $0xc4] ss:$8 sps:$4 sm:$0xff]  }
  0x42   :  { %v514_v33 = vld [vmem:[#allocation7 + $0xc0] ss:$8 sps:$4 sm:$0xff]   ;;  %v515_v34 = vld [vmem:[#allocation7 + $0xd4] ss:$8 sps:$4 sm:$0xff]   ;;  %v517_v35 = vld [vmem:[#allocation7 + $0xd0] ss:$8 sps:$4 sm:$0xff]  }
  0x43   :  { %351 = vmatpush1.bf16.msra.mxu1 %v484_v13  ;;  %v518_v36 = vld [vmem:[#allocation7 + $0xe4] ss:$8 sps:$4 sm:$0xff]   ;;  %v520_v37 = vld [vmem:[#allocation7 + $0xe0] ss:$8 sps:$4 sm:$0xff]   ;;  %v521_v38 = vld [vmem:[#allocation7 + $0xf4] ss:$8 sps:$4 sm:$0xff]  }
  0x44   :  { %352 = vmatprep.subr.bf16.mxu1 %v485_v14  ;;  %v523_v39 = vld [vmem:[#allocation7 + $0xf0] ss:$8 sps:$4 sm:$0xff]   ;;  %v73_v42 = vsub.s32 0, %v72_v41  ;;  %v77_v44 = vsub.s32 1, %v72_v41  ;;  %v398_v60 = vsub.s32 2, %v72_v41 }
  0x45   :  { %v69_v43 = vld [vmem:[%s693_s2] sm:$0x3] }
  0x46   :  { %v74_v45 = vrot.slane %v69_v43, %v73_v42  ;;  %v78_v46 = vrot.slane %v69_v43, %v77_v44  ;;  %v389_v57 = vld [vmem:[%s696_s5] sm:$0x3] }
  0x47   :  { %353 = vmatpush1.bf16.msra.mxu1 %v487_v15  ;;  %v390_v58 = vunpack.c.l.bf16 %v389_v57  ;;  %v174_v59 = vld [vmem:[%s695_s4] sm:$0x3] }
  0x48   :  { %354 = vmatprep.subr.bf16.mxu1 %v488_v16  ;;  %v179_v61 = vrot.slane %v174_v59, %v73_v42  ;;  %v183_v63 = vrot.slane %v174_v59, %v77_v44  ;;  %v467_v14 = vld [vmem:[#allocation2] ss:$0 sm:$0xff] }
  0x49   :  { %v395_v62 = vrot.slane %v390_v58, %v73_v42  ;;  %v399_v0 = vrot.slane %v390_v58, %v398_v60 }
  0x4b   :  { %355 = vmatpush1.bf16.msra.mxu1 %v490_v17  ;;  %v405_v4 = vrot.slane %v395_v62, %v73_v42  ;;  %v409_v7 = vrot.slane %v399_v0, %v73_v42 }
  0x4c   :  { %356 = vmatprep.subr.bf16.mxu1 %v491_v18 }
  0x4f   :  { %357 = vmatpush1.bf16.msra.mxu1 %v493_v19 }
  0x50   :  { %358 = vmatprep.subr.bf16.mxu1 %v494_v20 }
  0x53   :  { %359 = vmatpush1.bf16.msra.mxu1 %v496_v21 }
  0x54   :  { %360 = vmatprep.subr.bf16.mxu1 %v497_v22 }
  0x57   :  { %361 = vmatpush1.bf16.msra.mxu1 %v499_v23 }
  0x58   :  { %362 = vmatprep.subr.bf16.mxu1 %v500_v24 }
  0x5b   :  { %363 = vmatpush1.bf16.msra.mxu1 %v502_v25 }
  0x5c   :  { %364 = vmatprep.subr.bf16.mxu1 %v503_v26 }
  0x5f   :  { %365 = vmatpush1.bf16.msra.mxu1 %v505_v27 }
  0x60   :  { %366 = vmatprep.subr.bf16.mxu1 %v506_v28 }
  0x63   :  { %367 = vmatpush1.bf16.msra.mxu1 %v508_v29 }
  0x64   :  { %368 = vmatprep.subr.bf16.mxu1 %v509_v30 }
  0x67   :  { %369 = vmatpush1.bf16.msra.mxu1 %v511_v31 }
  0x68   :  { %370 = vmatprep.subr.bf16.mxu1 %v512_v32 }
  0x6b   :  { %371 = vmatpush1.bf16.msra.mxu1 %v514_v33 }
  0x6c   :  { %372 = vmatprep.subr.bf16.mxu1 %v515_v34 }
  0x6f   :  { %373 = vmatpush1.bf16.msra.mxu1 %v517_v35 }
  0x70   :  { %374 = vmatprep.subr.bf16.mxu1 %v518_v36 }
  0x73   :  { %375 = vmatpush1.bf16.msra.mxu1 %v520_v37 }
  0x74   :  { %376 = vmatprep.subr.bf16.mxu1 %v521_v38 }
  0x77   :  { %377 = vmatpush1.bf16.msra.mxu1 %v523_v39 }
 0x112   :  { %v131_v47 = vpop.f32.mrb[0].mxu0 }
 0x113   :  { %v132_v48 = vadd.f32 %v131_v47, %v74_v45  ;;  %v133_v49 = vpop.f32.mrb[1].mxu0 }
 0x114   :  { %v134_v50 = vadd.f32 %v133_v49, %v78_v46  ;;  %v135_v51 = vpop.f32.mrb[2].mxu0 }
 0x115   :  { %v138_v52 = vmax.f32 %v132_v48, 0.0  ;;  %v136_v53 = vpop.f32.mrb[3].mxu0 }
 0x116   :  { %v139_v54 = vmax.f32 %v134_v50, 0.0 }
 0x117   :  { %v140_v56 = vpack.c.bf16 %v138_v52, %v138_v52 }
 0x118   :  { %v141_v55 = vpack.c.bf16 %v139_v54, %v139_v54 }
 0x11a   :  { %378 = vmatprep.mubr.bf16.mxu1 %v141_v55 }
 0x11b   :  { %379 = vmatmul.mubr.bf16.vlgmr.msra.gmra.mrb[0].mxu1 %v140_v56 }
 0x1ee   :  { %v380_v1 = vpop.f32.mrb[0].mxu1 }
 0x1ef   :  { %v381_v2 = vadd.f32 %v380_v1, %v179_v61  ;;  %v382_v3 = vpop.f32.mrb[1].mxu1 }
 0x1f0   :  { %v383_v5 = vadd.f32 %v382_v3, %v183_v63  ;;  %v384_v6 = vpop.f32.mrb[2].mxu1 }
 0x1f1   :  { %v387_v8 = vmax.f32 %v381_v2, 0.0  ;;  %v385_v9 = vpop.f32.mrb[3].mxu1 }
 0x1f2   :  { %v388_v10 = vmax.f32 %v383_v5, 0.0 }
 0x1f3   :  { %v410_v11 = vmul.f32 %v405_v4, %v387_v8 }
 0x1f4   :  { %v411_v12 = vmul.f32 %v409_v7, %v388_v10 }
 0x1f6   :  { %v412_v13 = vadd.f32 %v411_v12, %v410_v11 }
 0x1f8   :  { %413 = vadd.xlane.f32.xlu0 %v412_v13 }
 0x285   :  { %v414_v15 = vpop.xlane.xlu0 %413 }
 0x286   :  { %v422_v16 = vadd.f32 %v467_v14, %v414_v15 }
 0x288   :  { %424 = vst.msk [vmem:[%s698_s7] sm:$0xff] %vm423_vm2, %v422_v16 }
 0x289   :  { %429 = vsyncpa [#allocation4], 1 }
 0x28a   :  { %430 = vsyncpa [#allocation6], 1 }

</bundles_post_ra>
